<compile_context>
chip_gen: v7x
topology: tpu7x:2x2x1
jax: 0.10.0
libtpu: 0.0.40
codegen_flags: <defaults>
</compile_context>

<pallas_src>
import math

import jax
import jax.numpy as jnp
from jax.experimental import pallas as pl
from jax.experimental.pallas import tpu as pltpu


# Conservative per-call VMEM budget (bytes) for the pipelined blocks; leaves
# headroom under every generation's scoped-VMEM default (v5e 16 MiB is the tightest).
_VMEM_BUDGET = 8 * 1024 * 1024


# --------------------------------------------------------------------------- #
# Kernel: pure VPU add. In the packed path all three refs have identical block
# shapes; in the simple path pos has 1 on the sublane axis and broadcasts.
# (No MXU / deeper pipelining: arithmetic intensity ~1 flop / 12 bytes, the
#  only levers are block size, lane/sublane density and grid-step count.)
# --------------------------------------------------------------------------- #
def _pe_add_kernel(x_ref, pos_ref, o_ref):
    o_ref[...] = x_ref[...] + pos_ref[...]


# --------------------------------------------------------------------------- #
# pe buffer (== torch register_buffer 'pe'), verified against the torch code:
#   pe[i, j, 0:half:2]  = sin(i*div)   pe[i, j, 1:half:2]    = cos(i*div)
#   pe[i, j, half::2]   = sin(j*div)   pe[i, j, half+1::2]   = cos(j*div)
# --------------------------------------------------------------------------- #
def build_pe_table(d_model, max_len, dtype=jnp.float32):
    if d_model % 4 != 0:
        # Message kept identical in spirit to the torch module (spec compatibility).
        raise ValueError(
            "Cannot use sin/cos positional encoding with odd dimension (got dim={:d})".format(d_model))
    half = d_model // 2
    k = half // 2
    div_term = jnp.exp(jnp.arange(0.0, half, 2.0) * -(math.log(10000.0) / half))   # (k,)
    pos = jnp.arange(0.0, max_len)[:, None]                                        # (max_len, 1)
    sin_p = jnp.sin(pos * div_term)                                                # (max_len, k)
    cos_p = jnp.cos(pos * div_term)                                                # (max_len, k)
    pe = jnp.zeros((max_len, max_len, d_model), dtype)
    pe = pe.at[:, :, 0:half:2].set(jnp.broadcast_to(sin_p[:, None, :], (max_len, max_len, k)))
    pe = pe.at[:, :, 1:half:2].set(jnp.broadcast_to(cos_p[:, None, :], (max_len, max_len, k)))
    pe = pe.at[:, :, half + 0::2].set(jnp.broadcast_to(sin_p[None, :, :], (max_len, max_len, k)))
    pe = pe.at[:, :, half + 1::2].set(jnp.broadcast_to(cos_p[None, :, :], (max_len, max_len, k)))
    return pe


def prepare_pos(pe, dim_len, dtype):
    """Slice + row-major flatten + cast of the pe buffer.

    Do this ONCE per (dim_len, dtype) and reuse across forward calls — the slice
    is a strided copy when dim_len < max_len, so it must not sit on the per-call path.
    Matches torch: pe[:dim_len, :dim_len].reshape(1, -1, d_model) (row-major i*dim_len+j).
    """
    max_len, _, d_model = pe.shape
    if dim_len > max_len:
        raise ValueError(f"dim_len={dim_len} exceeds max_len={max_len}")
    pos = jax.lax.slice(pe, (0, 0, 0), (dim_len, dim_len, d_model))
    return pos.reshape(dim_len * dim_len * d_model).astype(dtype)


# --------------------------------------------------------------------------- #
# Layout helpers
# --------------------------------------------------------------------------- #
def _sublane(dsize):
    # Dense sublane multiple per dtype: 8 for f32, 16 for bf16, 32 for int8.
    return 8 * max(1, 4 // dsize)


def _largest_divisor_multiple(n, unit, cap):
    """Largest d such that unit | d, d | n, d <= cap (assumes unit | n)."""
    m = n // unit
    top = min(cap // unit, m)
    for d in range(top, 0, -1):
        if m % d == 0:
            return d * unit
    return unit


# --------------------------------------------------------------------------- #
# Forward
# --------------------------------------------------------------------------- #
def _forward_packed(x, pos_flat, B, C, dsize, sub):
    """Sublane-packed layout: (B, rows, Lw) blocks with rows%sub==0, Lw%128==0."""
    # Lane width: widest of {1024,512,256,128} keeping rows-per-batch a multiple of sub.
    Lw = 128
    for cand in (1024, 512, 256):
        if C % cand == 0 and (C // cand) % sub == 0:
            Lw = cand
            break
    rows = C // Lw                                    # rows per batch (multiple of sub)

    # Rows per block from the double-buffered VMEM budget: 3 blocks (x, pe, out) x 2 buffers.
    bpr_cap = max(sub, _VMEM_BUDGET // (6 * Lw * dsize))
    bpr = _largest_divisor_multiple(rows, sub, bpr_cap)
    blocks_per_batch = rows // bpr

    x_view = x.reshape(B, rows, Lw)                   # contiguous reshape (free)
    pos_view = pos_flat.reshape(1, rows, Lw)

    out = pl.pallas_call(
        _pe_add_kernel,
        out_shape=jax.ShapeDtypeStruct((B, rows, Lw), x.dtype),
        # Batch is the innermost (fastest) grid axis so the pe block index is
        # unchanged across it and the pe tile stays resident (fetched once per row-block).
        grid=(blocks_per_batch, B),
        in_specs=[
            pl.BlockSpec((1, bpr, Lw), lambda i, b: (b, i, 0)),   # x: dense (sub,128) tiles
            pl.BlockSpec((1, bpr, Lw), lambda i, b: (0, i, 0)),   # pe: same block shape, reused per batch
        ],
        out_specs=pl.BlockSpec((1, bpr, Lw), lambda i, b: (b, i, 0)),
        compiler_params=pltpu.CompilerParams(
            dimension_semantics=("parallel", "parallel")),
        # NOTE: input_output_aliases={0: 0} would make this in-place, but only pays
        # when the caller donates x; left off to avoid defensive XLA copies.
    )(x_view, pos_view)
    return out.reshape(x.shape)


def _forward_simple(x, pos_flat, B, C, dsize, sub):
    """Small / unaligned fallback: (B, tc) blocks, pos broadcast across sublanes."""
    x_flat = x.reshape(B, C)
    pos2 = pos_flat.reshape(1, C)

    if C % 128 == 0:
        # VMEM budget aware of B and of sublane padding (B and 1 both pad up to `sub`),
        # double-buffered: x + out (Bp sublanes each) + pe (sub sublanes).
        Bp = ((B + sub - 1) // sub) * sub
        per_lane = 2 * dsize * (2 * Bp + sub)
        tc_cap = max(128, _VMEM_BUDGET // per_lane)
        tc = C if C <= tc_cap else _largest_divisor_multiple(C, 128, tc_cap)
    else:
        tc = C  # single full-extent block
        # TODO(synk): a very large C that is not a multiple of 128 would need padding to tile.

    out = pl.pallas_call(
        _pe_add_kernel,
        out_shape=jax.ShapeDtypeStruct((B, C), x.dtype),
        grid=(C // tc,),
        in_specs=[
            pl.BlockSpec((B, tc), lambda i: (0, i)),
            pl.BlockSpec((1, tc), lambda i: (0, i)),
        ],
        out_specs=pl.BlockSpec((B, tc), lambda i: (0, i)),
        compiler_params=pltpu.CompilerParams(dimension_semantics=("parallel",)),
    )(x_flat, pos2)
    return out.reshape(x.shape)


def positional_encoding_2d(x, pos_flat, dropout_p=0.0, *, min_packed_bytes=1 << 20):
    """Forward of PositionalEncoding2D.

    x:        (B, dim_len*dim_len, d_model); the sequence axis is the row-major
              (i*dim_len + j) flatten of the 2D grid, exactly as the torch forward's
              pe[:dim_len, :dim_len].reshape(1, -1, d_model).
    pos_flat: (dim_len*dim_len*d_model,) from prepare_pos() (cached buffer slice).
    """
    if dropout_p != 0.0:
        # TODO(synk): training-mode dropout not implemented; module default p=0.0 is identity.
        raise NotImplementedError("dropout_p > 0 is not supported by this Pallas forward")

    B, L, D = x.shape
    C = L * D
    if pos_flat.shape != (C,):
        raise ValueError(f"pos_flat must have shape ({C},), got {pos_flat.shape}")
    pos_flat = pos_flat.astype(x.dtype)

    dsize = jnp.dtype(x.dtype).itemsize
    sub = _sublane(dsize)
    total_bytes = B * C * dsize

    packed_ok = (C % (sub * 128) == 0)
    # Only pay multi-step grid overhead (and enable megacore sharding) when there is
    # enough work to amortize it; tiny shapes are launch-overhead bound -> one block.
    if packed_ok and total_bytes >= min_packed_bytes:
        return _forward_packed(x, pos_flat, B, C, dsize, sub)
    return _forward_simple(x, pos_flat, B, C, dsize, sub)


# --------------------------------------------------------------------------- #
# Reference + self-test
# --------------------------------------------------------------------------- #
def _reference(x, pe, dim_len):
    B, L, D = x.shape
    return x + pe[:dim_len, :dim_len].reshape(1, L, D)   # dropout(p=0) == identity


if __name__ == "__main__":
    # PositionalEncoding2D(d_model=32, dropout=0.0, max_len=16); forward(x, dim_len=8)
    B, dim_len, d_model, max_len = 2, 8, 32, 16
    L = dim_len * dim_len

    key = jax.random.PRNGKey(0)
    x = jax.random.normal(key, (B, L, d_model), dtype=jnp.float32)

    pe = build_pe_table(d_model, max_len)             # the module's registered buffer
    pos_flat = prepare_pos(pe, dim_len, x.dtype)      # hoisted once, reused every call

    ref = _reference(x, pe, dim_len)

    # 1) Default path for this tiny shape: single-step full-block kernel (launch-bound regime).
    out = jax.block_until_ready(positional_encoding_2d(x, pos_flat))
    assert out.shape == (B, L, d_model)
    assert jnp.allclose(out, ref, atol=1e-6, rtol=1e-6), "mismatch vs reference (simple path)"

    # 2) Force the sublane-packed multi-block path (used automatically for large B*L*D)
    #    on the same small data to exercise it end-to-end.
    out_p = jax.block_until_ready(positional_encoding_2d(x, pos_flat, min_packed_bytes=0))
    assert jnp.allclose(out_p, ref, atol=1e-6, rtol=1e-6), "mismatch vs reference (packed path)"

    print("KERNEL_OK")
</pallas_src>

<mosaic_0001>
module attributes {stable_mosaic.version = 11 : i64} {
  func.func @_pe_add_kernel(%arg0: i32, %arg1: memref<2x2048xf32, #tpu.memory_space<vmem>>, %arg2: memref<1x2048xf32, #tpu.memory_space<vmem>>, %arg3: memref<2x2048xf32, #tpu.memory_space<vmem>>) attributes {dimension_semantics = [#tpu.dimension_semantics<parallel>], iteration_bounds = array<i64: 1>, scalar_prefetch = 0 : i64, scratch_operands = 0 : i64, tpu.core_type = #tpu.core_type<tc>, window_params = [{transform_indices = @transform_0, window_bounds = array<i64: 2, 2048>}, {transform_indices = @transform_1, window_bounds = array<i64: 1, 2048>}, {transform_indices = @transform_2, window_bounds = array<i64: 2, 2048>}]} {
    %c0 = arith.constant 0 : index
    %c0_0 = arith.constant 0 : index
    %0 = vector.load %arg1[%c0, %c0_0] : memref<2x2048xf32, #tpu.memory_space<vmem>>, vector<2x2048xf32>
    %c0_1 = arith.constant 0 : index
    %c0_2 = arith.constant 0 : index
    %1 = vector.load %arg2[%c0_1, %c0_2] : memref<1x2048xf32, #tpu.memory_space<vmem>>, vector<1x2048xf32>
    %2 = vector.broadcast %1 : vector<1x2048xf32> to vector<2x2048xf32>
    %3 = arith.addf %0, %2 : vector<2x2048xf32>
    %c0_3 = arith.constant 0 : index
    %c0_4 = arith.constant 0 : index
    %4 = vector.load %arg3[%c0_3, %c0_4] : memref<2x2048xf32, #tpu.memory_space<vmem>>, vector<2x2048xf32>
    tpu.vector_store %arg3[%c0_3, %c0_4], %3 {strides = array<i32>} : memref<2x2048xf32, #tpu.memory_space<vmem>>, vector<2x2048xf32>,
    return
  }
  func.func @transform_0(%arg0: i32) -> (i32, i32) {
    %c0_i32 = arith.constant 0 : i32
    %c0_i32_0 = arith.constant 0 : i32
    return %c0_i32, %arg0 : i32, i32
  }
  func.func @transform_1(%arg0: i32) -> (i32, i32) {
    %c0_i32 = arith.constant 0 : i32
    %c0_i32_0 = arith.constant 0 : i32
    return %c0_i32, %arg0 : i32, i32
  }
  func.func @transform_2(%arg0: i32) -> (i32, i32) {
    %c0_i32 = arith.constant 0 : i32
    %c0_i32_0 = arith.constant 0 : i32
    return %c0_i32, %arg0 : i32, i32
  }
}

</mosaic_0001>

<bundles_post_ra>
// kernel: tpu_custom_call.1
= control target key start
LH: loop header
LB: loop body
LE: loop exit
PB: predicated region body
PF: predicated region fallthrough
CT: control target
= control target key end

     0   :  { %7 = vsyncpa [#allocation3], 0  ;;  %s335_s0 = inlined_call_operand.hbm [shape: f32[2,2048], index: 0, kind: input, shape index: {}]   ;;  %s336_s1 = inlined_call_operand.hbm [shape: f32[1,2048], index: 1, kind: input, shape index: {}]   ;;  %s337_s2 = inlined_call_operand.hbm [shape: f32[2,2048], index: 2, kind: output, shape index: {}]  }
   0x1   :  { %8 = vsyncpa [#allocation6], 0 }
   0x2   :  { %9 = vsyncpa [#allocation4], 0  ;;  %s280_s9 = smov [#allocation2]   ;;  %s281_s11 = smov [#allocation5]  }
   0x3   :  { %s16_s10 = sshll.u32 %s280_s9, 4  ;;  %s26_s12 = sshll.u32 %s281_s11, 4  ;;  %s17_s10 = int_to_ptr.vmem [resolvable:$true] %s16_s10  ;;  %s27_s12 = int_to_ptr.vmem [resolvable:$true] %s26_s12 }
   0x4   :  { %s208_s15 = scalar_lea.hbm %s335_s0, 512 }
   0x5   :  { %p209_p0 = scmp.ne.s32.totalorder %s335_s0, %s208_s15  ;;  %p212_p1 = scmp.lt.u32.totalorder %s208_s15, %s335_s0 }
   0x7   :  { %p214_p2 = pnand %p212_p1, %p209_p0 }
   0x9   :  { %217 = shalt.err (!%p214_p2)
}
   0xa   :  { %s218_s20 = scalar_lea.vmem %s17_s10, 512  ;;  %p223_p4 = scmp.lt.s32.totalorder %s17_s10, %s17_s10 }
   0xb   :  { %p219_p3 = scmp.ne.s32.totalorder %s17_s10, %s218_s20  ;;  %p224_p5 = scmp.lt.s32.totalorder %s218_s20, %s218_s20 }
   0xd   :  { %p225_p6 = por %p224_p5, %p223_p4 }
   0xf   :  { %p226_p7 = pnand %p225_p6, %p219_p3 }
  0x11   :  { %229 = shalt.err (!%p226_p7)
}
  0x12   :  { %19 = dma.hbm_to_vmem [thread:$0]  %s335_s0, 512, %s17_s10, [#allocation3]  }
  0x13   :  { %s230_s25 = scalar_lea.hbm %s336_s1, 256 }
  0x14   :  { %p231_p8 = scmp.ne.s32.totalorder %s336_s1, %s230_s25  ;;  %p234_p9 = scmp.lt.u32.totalorder %s230_s25, %s336_s1 }
  0x16   :  { %p236_p10 = pnand %p234_p9, %p231_p8 }
  0x18   :  { %239 = shalt.err (!%p236_p10)
}
  0x19   :  { %s240_s30 = scalar_lea.vmem %s27_s12, 256  ;;  %p245_p12 = scmp.lt.s32.totalorder %s27_s12, %s27_s12 }
  0x1a   :  { %p241_p11 = scmp.ne.s32.totalorder %s27_s12, %s240_s30  ;;  %p246_p13 = scmp.lt.s32.totalorder %s240_s30, %s240_s30 }
  0x1c   :  { %p247_p0 = por %p246_p13, %p245_p12 }
  0x1e   :  { %p248_p1 = pnand %p247_p0, %p241_p11 }
  0x20   :  { %251 = shalt.err (!%p248_p1)
}
  0x21   :  { %29 = dma.hbm_to_vmem [thread:$0]  %s336_s1, 256, %s27_s12, [#allocation6]  }
  0x22   :  { %274 = dma.done.wait [#allocation3], 512  }
  0x23   :  { %275 = vsyncadd [#allocation3], 4294966784 }
  0x24   :  { %276 = dma.done.wait [#allocation6], 256  }
  0x25   :  { %277 = vsyncadd [#allocation6], 4294967040  ;;  %v44_v0 = vlaneseq  ;;  %v282_v1 = vmov 1983009808   ;;  %v40_v13 = vld [vmem:[#allocation5] sm:$0xff]  ;;  %v41_v19 = vld [vmem:[#allocation5 + $0x8] sm:$0xff] }
  0x26   :  { %v111_v2 = vunpack.c.l.s4 %v282_v1  ;;  %v36_v36 = vld [vmem:[#allocation2] sm:$0xff]  ;;  %v37_v42 = vld [vmem:[#allocation2 + $0x8] sm:$0xff]  ;;  %v38_v50 = vld [vmem:[#allocation2 + $0x10] sm:$0xff]  ;;  %s283_s1 = smov [#allocation7]  }
  0x27   :  { %v45_v3 = vshrl.u32 %v44_v0, 7  ;;  %v39_v57 = vld [vmem:[#allocation2 + $0x18] sm:$0xff]  ;;  %s194_s4 = sshll.u32 %s283_s1, 4  ;;  %s195_s4 = int_to_ptr.vmem [resolvable:$true] %s194_s4 }
  0x28   :  { %v112_v4 = vunpack.c.0.s8 %v111_v2  ;;  %s252_s5 = scalar_lea.vmem %s195_s4, 512  ;;  %p257_p3 = scmp.lt.s32.totalorder %s195_s4, %s195_s4 }
  0x29   :  { %v46_v5 = vsub.s32 0, %v45_v3  ;;  %v50_v6 = vsub.s32 1, %v45_v3  ;;  %v54_v7 = vsub.s32 2, %v45_v3  ;;  %v58_v8 = vsub.s32 3, %v45_v3  ;;  %p253_p2 = scmp.ne.s32.totalorder %s195_s4, %s252_s5  ;;  %p258_p4 = scmp.lt.s32.totalorder %s252_s5, %s252_s5 }
  0x2a   :  { %v62_v9 = vsub.s32 4, %v45_v3  ;;  %v66_v10 = vsub.s32 5, %v45_v3  ;;  %v70_v11 = vsub.s32 6, %v45_v3  ;;  %v74_v12 = vsub.s32 7, %v45_v3 }
  0x2b   :  { %v115_v14 = vsub.s32 %v112_v4, %v45_v3  ;;  %v47_v15 = vrot.slane %v40_v13, %v46_v5  ;;  %v51_v16 = vrot.slane %v40_v13, %v50_v6  ;;  %v55_v17 = vrot.slane %v40_v13, %v54_v7  ;;  %p259_p5 = por %p258_p4, %p257_p3 }
  0x2c   :  { %v59_v18 = vrot.slane %v40_v13, %v58_v8  ;;  %v63_v20 = vrot.slane %v40_v13, %v62_v9  ;;  %v67_v21 = vrot.slane %v40_v13, %v66_v10  ;;  %v71_v22 = vrot.slane %v40_v13, %v70_v11 }
  0x2d   :  { %v75_v23 = vrot.slane %v40_v13, %v74_v12  ;;  %v108_v24 = vcombine.low %v47_v15, %v51_v16  ;;  %v79_v26 = vrot.slane %v41_v19, %v46_v5  ;;  %v83_v27 = vrot.slane %v41_v19, %v50_v6  ;;  %p260_p6 = pnand %p259_p5, %p253_p2 }
  0x2e   :  { %v109_v25 = vcombine.low %v55_v17, %v59_v18  ;;  %v125_v28 = vcombine.low %v63_v20, %v67_v21  ;;  %v87_v30 = vrot.slane %v41_v19, %v54_v7  ;;  %v91_v31 = vrot.slane %v41_v19, %v58_v8 }
  0x2f   :  { %v126_v29 = vcombine.low %v71_v22, %v75_v23  ;;  %v116_v32 = vrot.slane %v108_v24, %v115_v14  ;;  %v142_v34 = vcombine.low %v79_v26, %v83_v27  ;;  %v95_v35 = vrot.slane %v41_v19, %v62_v9 }
  0x30   :  { %v123_v33 = vrot.slane %v109_v25, %v115_v14  ;;  %v133_v37 = vrot.slane %v125_v28, %v115_v14  ;;  %v143_v39 = vcombine.low %v87_v30, %v91_v31  ;;  %v99_v40 = vrot.slane %v41_v19, %v66_v10 }
  0x31   :  { %v140_v38 = vrot.slane %v126_v29, %v115_v14  ;;  %v150_v43 = vrot.slane %v142_v34, %v115_v14  ;;  %v103_v44 = vrot.slane %v41_v19, %v70_v11  ;;  %v107_v45 = vrot.slane %v41_v19, %v74_v12 }
  0x32   :  { %v124_v41 = vcombine.low %v116_v32, %v123_v33  ;;  %v157_v47 = vrot.slane %v143_v39, %v115_v14  ;;  %v159_v48 = vcombine.low %v95_v35, %v99_v40 }
  0x33   :  { %v141_v46 = vcombine.low %v133_v37, %v140_v38  ;;  %v160_v51 = vcombine.low %v103_v44, %v107_v45 }
  0x34   :  { %v180_v49 = vadd.f32 %v124_v41, %v36_v36  ;;  %v158_v53 = vcombine.low %v150_v43, %v157_v47  ;;  %v167_v54 = vrot.slane %v159_v48, %v115_v14 }
  0x35   :  { %v181_v52 = vadd.f32 %v141_v46, %v37_v42  ;;  %v174_v55 = vrot.slane %v160_v51, %v115_v14 }
  0x36   :  { %184 = vst [vmem:[#allocation7] sm:$0xff] %v180_v49  ;;  %v182_v56 = vadd.f32 %v158_v53, %v38_v50 }
  0x37   :  { %185 = vst [vmem:[#allocation7 + $0x8] sm:$0xff] %v181_v52  ;;  %v175_v58 = vcombine.low %v167_v54, %v174_v55 }
  0x38   :  { %186 = vst [vmem:[#allocation7 + $0x10] sm:$0xff] %v182_v56 }
  0x39   :  { %v183_v59 = vadd.f32 %v175_v58, %v39_v57 }
  0x3b   :  { %187 = vst [vmem:[#allocation7 + $0x18] sm:$0xff] %v183_v59 }
  0x3c   :  { %263 = shalt.err (!%p260_p6)
}
  0x3d   :  { %s264_s8 = scalar_lea.hbm %s337_s2, 512 }
  0x3e   :  { %p265_p7 = scmp.ne.s32.totalorder %s337_s2, %s264_s8  ;;  %p268_p8 = scmp.lt.u32.totalorder %s264_s8, %s337_s2 }
  0x40   :  { %p270_p9 = pnand %p268_p8, %p265_p7 }
  0x42   :  { %273 = shalt.err (!%p270_p9)
}
  0x43   :  { %197 = dma.vmem_to_hbm [thread:$0]  %s195_s4, 512, %s337_s2, [#allocation4]  }
  0x44   :  { %278 = dma.done.wait [#allocation4], 512  }
  0x45   :  { %279 = vsyncadd [#allocation4], 4294966784 }
  0x46   :  { %201 = vsyncpa [#allocation3], 1 }
  0x47   :  { %202 = vsyncpa [#allocation6], 1 }
  0x48   :  { %203 = vsyncpa [#allocation4], 1 }

</bundles_post_ra>
